<compile_context>
chip_gen: v7x
topology: tpu7x:2x2x1
jax: 0.10.0
libtpu: 0.0.40
codegen_flags: <defaults>
</compile_context>

<pallas_src>
import functools

import jax
import jax.numpy as jnp
from jax.experimental import pallas as pl
from jax.experimental.pallas import tpu as pltpu

MAX_DIST = 100.0
_LANES = 128
_MAX_BLOCK_B = 512
_VMEM_LIMIT_BYTES = 48 * 1024 * 1024   # v5e scoped default is only 16 MiB


def _choose_block_b(b: int, p: int) -> int:
    """Largest batch block that keeps ~(2x double-buffered dists + 3x f32 temps) in budget."""
    budget = 24 * 1024 * 1024
    per_row = 5 * max(p, _LANES) * 4
    cap = max(8, min(_MAX_BLOCK_B, (budget // per_row) // 8 * 8))
    if b <= cap:
        return b          # full-dim block: single grid step, no tail masking needed
    return cap            # multiple of 8; ragged tail masked in-kernel


def _cross_entropy_cols(logits, labels):
    """Per-row CE as a [Bb, 1] column (log-sum-exp minus picked logit)."""
    bb, c = logits.shape
    class_iota = jax.lax.broadcasted_iota(jnp.int32, (bb, c), 1)
    onehot = (class_iota == labels).astype(jnp.float32)                 # [Bb, C]
    m = jnp.max(logits, axis=1, keepdims=True)                          # [Bb, 1]
    lse = m + jnp.log(jnp.sum(jnp.exp(logits - m), axis=1, keepdims=True))
    picked = jnp.sum(onehot * logits, axis=1, keepdims=True)
    return lse - picked                                                 # [Bb, 1]


def _scalar_tile(ce_sum, clst_sum=None, sep_sum=None):
    """Scatter up to 3 scalars into sublane 0 / lanes 0..2 of a dense (8, 128) tile."""
    lane = jax.lax.broadcasted_iota(jnp.int32, (8, _LANES), 1)
    sub = jax.lax.broadcasted_iota(jnp.int32, (8, _LANES), 0)
    tile = jnp.where((sub == 0) & (lane == 0), ce_sum, 0.0)
    if clst_sum is not None:
        tile = jnp.where((sub == 0) & (lane == 1), clst_sum, tile)
        tile = jnp.where((sub == 0) & (lane == 2), sep_sum, tile)
    return tile


def _protopnet_full_kernel(logits_ref, labels_ref, dists_ref, pclass_ref, out_ref,
                           *, batch_size: int, block_b: int):
    # Cast-on-read: inputs keep their HBM dtype; cast rides the VPU.
    logits = logits_ref[...].astype(jnp.float32)      # [Bb, C]
    labels = labels_ref[...]                          # [Bb, 1] int32
    dists = dists_ref[...].astype(jnp.float32)        # [Bb, P]   (P = full dim, no pad)
    pclass = pclass_ref[...]                          # [1, P]    int32 per-prototype class

    bb = logits.shape[0]

    # Valid-row mask for the ragged last block (jnp.where, not multiply: NaN-safe
    # against garbage OOB tail rows).
    row = (pl.program_id(0) * block_b
           + jax.lax.broadcasted_iota(jnp.int32, (bb, 1), 0))
    valid = row < batch_size                                             # [Bb, 1] bool

    # ---- cross entropy per row ---------------------------------------------
    ce_col = _cross_entropy_cols(logits, labels)                         # [Bb, 1]

    # ---- cluster / separation per row --------------------------------------
    # ProtoPNet's association matrix is one-hot per prototype, so gt_mask reduces to
    # an integer compare against the per-prototype class id (precomputed on host).
    # TODO(synk): non-one-hot association matrices would need the matmul path back.
    gt_mask = (pclass == labels).astype(jnp.float32)                     # [Bb, P]
    inv = MAX_DIST - dists                                               # [Bb, P]
    gt_prod = inv * gt_mask                                              # reused below
    clst_col = MAX_DIST - jnp.max(gt_prod, axis=1, keepdims=True)        # [Bb, 1]
    # (1 - gt_mask) path: inv - inv*gt_mask (masked value is exactly 0.0, as in PyTorch)
    sep_col = MAX_DIST - jnp.max(inv - gt_prod, axis=1, keepdims=True)   # [Bb, 1]

    # ---- reduce over the batch FIRST, then scatter 3 scalars into one tile --
    ce_sum = jnp.sum(jnp.where(valid, ce_col, 0.0))
    clst_sum = jnp.sum(jnp.where(valid, clst_col, 0.0))
    sep_sum = jnp.sum(jnp.where(valid, sep_col, 0.0))

    out_ref[...] = _scalar_tile(ce_sum, clst_sum, sep_sum)               # (8, 128)


def _protopnet_ce_kernel(logits_ref, labels_ref, out_ref,
                         *, batch_size: int, block_b: int):
    logits = logits_ref[...].astype(jnp.float32)
    labels = labels_ref[...]
    bb = logits.shape[0]
    row = (pl.program_id(0) * block_b
           + jax.lax.broadcasted_iota(jnp.int32, (bb, 1), 0))
    valid = row < batch_size
    ce_col = _cross_entropy_cols(logits, labels)
    ce_sum = jnp.sum(jnp.where(valid, ce_col, 0.0))
    out_ref[...] = _scalar_tile(ce_sum)


@functools.partial(jax.jit, static_argnames=("l_clst_coef", "l_sep_coef"))
def protopnet_loss(outputs, batch, proto_class_association,
                   l_clst_coef: float, l_sep_coef: float):
    """JAX/Pallas equivalent of ProtoPNetLoss.forward.

    outputs = (class_logits, concept_logits, min_l2_dists, l2_dists)
    batch   = (images, labels, concept_labels)   -- only labels is used
    """
    class_logits, _concept_logits, min_l2_dists, _l2_dists = outputs
    _, labels, _concept_labels = batch

    b, c = class_logits.shape
    p = min_l2_dists.shape[1]
    labels_2d = labels.astype(jnp.int32).reshape(-1, 1)                  # [B, 1]

    # Gate matches the PyTorch module exactly: both extra terms only when BOTH != 0.
    compute_costs = (l_clst_coef != 0) and (l_sep_coef != 0)

    block_b = _choose_block_b(b, p if compute_costs else _LANES)
    nb = pl.cdiv(b, block_b)
    out_shape = jax.ShapeDtypeStruct((nb * 8, _LANES), jnp.float32)
    out_spec = pl.BlockSpec((8, _LANES), lambda i: (i, 0))
    compiler_params = pltpu.CompilerParams(
        dimension_semantics=("parallel",),            # megacore-shard batch (v7x)
        vmem_limit_bytes=_VMEM_LIMIT_BYTES)

    if compute_costs:
        # One-hot association -> per-prototype class id; no host padding, no [P, C] tile.
        proto_class = jnp.argmax(proto_class_association, axis=1)
        proto_class = proto_class.astype(jnp.int32).reshape(1, p)        # [1, P]

        cost = pl.CostEstimate(
            flops=6 * b * p + 10 * b * c,
            transcendentals=b * (c + 1),
            bytes_accessed=(b * p * min_l2_dists.dtype.itemsize
                            + b * c * class_logits.dtype.itemsize
                            + b * 4 + p * 4 + nb * 8 * _LANES * 4))

        kernel = functools.partial(_protopnet_full_kernel,
                                   batch_size=b, block_b=block_b)
        partials = pl.pallas_call(
            kernel,
            out_shape=out_shape,
            grid=(nb,),
            in_specs=[
                pl.BlockSpec((block_b, c), lambda i: (i, 0)),    # class_logits
                pl.BlockSpec((block_b, 1), lambda i: (i, 0)),    # labels
                pl.BlockSpec((block_b, p), lambda i: (i, 0)),    # min_l2_dists (full P)
                pl.BlockSpec((1, p), lambda i: (0, 0)),          # per-prototype class id
            ],
            out_specs=out_spec,
            compiler_params=compiler_params,
            cost_estimate=cost,
        )(class_logits, labels_2d, min_l2_dists, proto_class)
    else:
        # CE-only variant: never touches min_l2_dists / association matrix in HBM.
        cost = pl.CostEstimate(
            flops=10 * b * c,
            transcendentals=b * (c + 1),
            bytes_accessed=(b * c * class_logits.dtype.itemsize
                            + b * 4 + nb * 8 * _LANES * 4))

        kernel = functools.partial(_protopnet_ce_kernel,
                                   batch_size=b, block_b=block_b)
        partials = pl.pallas_call(
            kernel,
            out_shape=out_shape,
            grid=(nb,),
            in_specs=[
                pl.BlockSpec((block_b, c), lambda i: (i, 0)),    # class_logits
                pl.BlockSpec((block_b, 1), lambda i: (i, 0)),    # labels
            ],
            out_specs=out_spec,
            compiler_params=compiler_params,
            cost_estimate=cost,
        )(class_logits, labels_2d)

    sums = jnp.sum(partials, axis=0)                              # (128,) tiny XLA reduce
    inv_b = 1.0 / b
    loss_dict = {"l_y": sums[0] * inv_b}
    if compute_costs:
        loss_dict["l_clst"] = l_clst_coef * (sums[1] * inv_b)
        loss_dict["l_sep"] = l_sep_coef * (sums[2] * inv_b)
    return loss_dict


def _reference(outputs, batch, pca, l_clst_coef, l_sep_coef, max_dist=100.0):
    """Pure-JAX reference mirroring the PyTorch module."""
    class_logits, _, min_l2_dists, _ = outputs
    _, labels, _ = batch
    logp = jax.nn.log_softmax(class_logits, axis=-1)
    l_y = -jnp.mean(jnp.take_along_axis(logp, labels[:, None], axis=1))
    out = {"l_y": l_y}
    if l_clst_coef != 0 and l_sep_coef != 0:
        gt_mask = pca[:, labels].T.astype(jnp.float32)
        gt_inv = jnp.max((max_dist - min_l2_dists) * gt_mask, axis=1)
        out["l_clst"] = l_clst_coef * jnp.mean(max_dist - gt_inv)
        non_inv = jnp.max((max_dist - min_l2_dists) * (1.0 - gt_mask), axis=1)
        out["l_sep"] = l_sep_coef * jnp.mean(max_dist - non_inv)
    return out


if __name__ == "__main__":
    key = jax.random.PRNGKey(0)
    B, C, P, NC = 8, 4, 16, 6   # batch, classes, prototypes, concepts

    k1, k2, k3, k4, k5 = jax.random.split(key, 5)
    class_logits = jax.random.normal(k1, (B, C), dtype=jnp.float32)
    concept_logits = jax.random.normal(k2, (B, NC), dtype=jnp.float32)       # unused by loss
    min_l2_dists = jax.random.uniform(k3, (B, P), dtype=jnp.float32) * 10.0
    l2_dists = jax.random.uniform(k4, (B, P, 7, 7), dtype=jnp.float32)       # unused by loss
    labels = jax.random.randint(k5, (B,), 0, C, dtype=jnp.int32)
    concept_labels = jnp.zeros((B, NC), dtype=jnp.float32)
    images = jnp.zeros((B, 3, 16, 16), dtype=jnp.float32)                    # placeholder

    # deterministic prototype->class association: P//C prototypes per class (one-hot)
    proto_class_association = (
        jax.nn.one_hot(jnp.arange(P) // (P // C), C, dtype=jnp.float32))     # [P, C]

    outputs = (class_logits, concept_logits, min_l2_dists, l2_dists)
    batch = (images, labels, concept_labels)

    # --- full loss (both coefficients nonzero) ---
    l_clst_coef, l_sep_coef = 0.8, -0.08
    out = protopnet_loss(outputs, batch, proto_class_association,
                         l_clst_coef=l_clst_coef, l_sep_coef=l_sep_coef)
    out = jax.tree_util.tree_map(jax.block_until_ready, out)
    ref = _reference(outputs, batch, proto_class_association, l_clst_coef, l_sep_coef)
    for k in ("l_y", "l_clst", "l_sep"):
        assert jnp.allclose(out[k], ref[k], rtol=1e-5, atol=1e-5), (k, out[k], ref[k])

    # --- CE-only variant (one coefficient is zero -> module skips both extra terms) ---
    out_ce = protopnet_loss(outputs, batch, proto_class_association,
                            l_clst_coef=0.0, l_sep_coef=-0.08)
    out_ce = jax.tree_util.tree_map(jax.block_until_ready, out_ce)
    ref_ce = _reference(outputs, batch, proto_class_association, 0.0, -0.08)
    assert set(out_ce.keys()) == {"l_y"}
    assert jnp.allclose(out_ce["l_y"], ref_ce["l_y"], rtol=1e-5, atol=1e-5)

    print("KERNEL_OK")
</pallas_src>

<mosaic_0001>
module attributes {stable_mosaic.version = 11 : i64} {
  func.func @_protopnet_full_kernel(%arg0: i32, %arg1: memref<8x4xf32, #tpu.memory_space<vmem>>, %arg2: memref<8x1xi32, #tpu.memory_space<vmem>>, %arg3: memref<8x16xf32, #tpu.memory_space<vmem>>, %arg4: memref<1x16xi32, #tpu.memory_space<vmem>>, %arg5: memref<8x128xf32, #tpu.memory_space<vmem>>) attributes {dimension_semantics = [#tpu.dimension_semantics<parallel>], iteration_bounds = array<i64: 1>, scalar_prefetch = 0 : i64, scratch_operands = 0 : i64, tpu.core_type = #tpu.core_type<tc>, window_params = [{transform_indices = @transform_0, window_bounds = array<i64: 8, 4>}, {transform_indices = @transform_1, window_bounds = array<i64: 8, 1>}, {transform_indices = @transform_2, window_bounds = array<i64: 8, 16>}, {pipeline_mode = #tpu.pipeline_mode<synchronous>, transform_indices = @transform_3, window_bounds = array<i64: 1, 16>}, {transform_indices = @transform_4, window_bounds = array<i64: 8, 128>}]} {
    %c0 = arith.constant 0 : index
    %c0_0 = arith.constant 0 : index
    %0 = vector.load %arg1[%c0, %c0_0] : memref<8x4xf32, #tpu.memory_space<vmem>>, vector<8x4xf32>
    %c0_1 = arith.constant 0 : index
    %c0_2 = arith.constant 0 : index
    %1 = vector.load %arg2[%c0_1, %c0_2] : memref<8x1xi32, #tpu.memory_space<vmem>>, vector<8x1xi32>
    %c0_3 = arith.constant 0 : index
    %c0_4 = arith.constant 0 : index
    %2 = vector.load %arg3[%c0_3, %c0_4] : memref<8x16xf32, #tpu.memory_space<vmem>>, vector<8x16xf32>
    %c0_5 = arith.constant 0 : index
    %c0_6 = arith.constant 0 : index
    %3 = vector.load %arg4[%c0_5, %c0_6] : memref<1x16xi32, #tpu.memory_space<vmem>>, vector<1x16xi32>
    %c8_i32 = arith.constant 8 : i32
    %4 = arith.muli %arg0, %c8_i32 : i32
    %5 = tpu.iota {dimensions = array<i32: 0>} : vector<8x1xi32>
    %6 = vector.broadcast %4 : i32 to vector<8x1xi32>
    %7 = arith.addi %6, %5 : vector<8x1xi32>
    %c8_i32_7 = arith.constant 8 : i32
    %8 = vector.broadcast %c8_i32_7 : i32 to vector<8x1xi32>
    %9 = arith.cmpi slt, %7, %8 : vector<8x1xi32>
    %10 = tpu.iota {dimensions = array<i32: 1>} : vector<8x4xi32>
    %11 = vector.broadcast %1 : vector<8x1xi32> to vector<8x4xi32>
    %12 = arith.cmpi eq, %10, %11 : vector<8x4xi32>
    %13 = arith.extui %12 : vector<8x4xi1> to vector<8x4xi32>
    %14 = arith.sitofp %13 : vector<8x4xi32> to vector<8x4xf32>
    %cst = arith.constant dense<0xFF800000> : vector<8xf32>
    %15 = vector.multi_reduction <maximumf>, %0, %cst [1] : vector<8x4xf32> to vector<8xf32>
    %16 = vector.shape_cast %15 : vector<8xf32> to vector<8x1xf32>
    %17 = vector.broadcast %16 : vector<8x1xf32> to vector<8x4xf32>
    %18 = arith.subf %0, %17 : vector<8x4xf32>
    %19 = math.exp %18 : vector<8x4xf32>
    %cst_8 = arith.constant dense<0.000000e+00> : vector<8xf32>
    %20 = vector.multi_reduction <add>, %19, %cst_8 [1] : vector<8x4xf32> to vector<8xf32>
    %21 = vector.shape_cast %20 : vector<8xf32> to vector<8x1xf32>
    %22 = math.log %21 : vector<8x1xf32>
    %23 = arith.addf %16, %22 : vector<8x1xf32>
    %24 = arith.mulf %14, %0 : vector<8x4xf32>
    %cst_9 = arith.constant dense<0.000000e+00> : vector<8xf32>
    %25 = vector.multi_reduction <add>, %24, %cst_9 [1] : vector<8x4xf32> to vector<8xf32>
    %26 = vector.shape_cast %25 : vector<8xf32> to vector<8x1xf32>
    %27 = arith.subf %23, %26 : vector<8x1xf32>
    %28 = vector.broadcast %3 : vector<1x16xi32> to vector<8x16xi32>
    %29 = vector.broadcast %1 : vector<8x1xi32> to vector<8x16xi32>
    %30 = arith.cmpi eq, %28, %29 : vector<8x16xi32>
    %31 = arith.extui %30 : vector<8x16xi1> to vector<8x16xi32>
    %32 = arith.sitofp %31 : vector<8x16xi32> to vector<8x16xf32>
    %cst_10 = arith.constant 1.000000e+02 : f32
    %33 = vector.broadcast %cst_10 : f32 to vector<8x16xf32>
    %34 = arith.subf %33, %2 : vector<8x16xf32>
    %35 = arith.mulf %34, %32 : vector<8x16xf32>
    %cst_11 = arith.constant dense<0xFF800000> : vector<8xf32>
    %36 = vector.multi_reduction <maximumf>, %35, %cst_11 [1] : vector<8x16xf32> to vector<8xf32>
    %37 = vector.shape_cast %36 : vector<8xf32> to vector<8x1xf32>
    %cst_12 = arith.constant 1.000000e+02 : f32
    %38 = vector.broadcast %cst_12 : f32 to vector<8x1xf32>
    %39 = arith.subf %38, %37 : vector<8x1xf32>
    %40 = arith.subf %34, %35 : vector<8x16xf32>
    %cst_13 = arith.constant dense<0xFF800000> : vector<8xf32>
    %41 = vector.multi_reduction <maximumf>, %40, %cst_13 [1] : vector<8x16xf32> to vector<8xf32>
    %42 = vector.shape_cast %41 : vector<8xf32> to vector<8x1xf32>
    %cst_14 = arith.constant 1.000000e+02 : f32
    %43 = vector.broadcast %cst_14 : f32 to vector<8x1xf32>
    %44 = arith.subf %43, %42 : vector<8x1xf32>
    %cst_15 = arith.constant 0.000000e+00 : f32
    %45 = vector.broadcast %cst_15 : f32 to vector<8x1xf32>
    %46 = arith.select %9, %27, %45 : vector<8x1xi1>, vector<8x1xf32>
    %47 = vector.shape_cast %46 : vector<8x1xf32> to vector<1x8x1xf32>
    %cst_16 = arith.constant dense<0.000000e+00> : vector<1xf32>
    %48 = vector.multi_reduction <add>, %47, %cst_16 [1, 2] : vector<1x8x1xf32> to vector<1xf32>
    %49 = vector.shape_cast %48 : vector<1xf32> to vector<1x1x1xf32>
    %50 = vector.extract %49[0, 0, 0] : f32 from vector<1x1x1xf32>
    %cst_17 = arith.constant 0.000000e+00 : f32
    %51 = vector.broadcast %cst_17 : f32 to vector<8x1xf32>
    %52 = arith.select %9, %39, %51 : vector<8x1xi1>, vector<8x1xf32>
    %53 = vector.shape_cast %52 : vector<8x1xf32> to vector<1x8x1xf32>
    %cst_18 = arith.constant dense<0.000000e+00> : vector<1xf32>
    %54 = vector.multi_reduction <add>, %53, %cst_18 [1, 2] : vector<1x8x1xf32> to vector<1xf32>
    %55 = vector.shape_cast %54 : vector<1xf32> to vector<1x1x1xf32>
    %56 = vector.extract %55[0, 0, 0] : f32 from vector<1x1x1xf32>
    %cst_19 = arith.constant 0.000000e+00 : f32
    %57 = vector.broadcast %cst_19 : f32 to vector<8x1xf32>
    %58 = arith.select %9, %44, %57 : vector<8x1xi1>, vector<8x1xf32>
    %59 = vector.shape_cast %58 : vector<8x1xf32> to vector<1x8x1xf32>
    %cst_20 = arith.constant dense<0.000000e+00> : vector<1xf32>
    %60 = vector.multi_reduction <add>, %59, %cst_20 [1, 2] : vector<1x8x1xf32> to vector<1xf32>
    %61 = vector.shape_cast %60 : vector<1xf32> to vector<1x1x1xf32>
    %62 = vector.extract %61[0, 0, 0] : f32 from vector<1x1x1xf32>
    %63 = tpu.iota {dimensions = array<i32: 1>} : vector<8x128xi32>
    %64 = tpu.iota {dimensions = array<i32: 0>} : vector<8x128xi32>
    %c0_i32 = arith.constant 0 : i32
    %65 = vector.broadcast %c0_i32 : i32 to vector<8x128xi32>
    %66 = arith.cmpi eq, %64, %65 : vector<8x128xi32>
    %c0_i32_21 = arith.constant 0 : i32
    %67 = vector.broadcast %c0_i32_21 : i32 to vector<8x128xi32>
    %68 = arith.cmpi eq, %63, %67 : vector<8x128xi32>
    %69 = arith.andi %66, %68 : vector<8x128xi1>
    %cst_22 = arith.constant 0.000000e+00 : f32
    %70 = vector.broadcast %50 : f32 to vector<8x128xf32>
    %71 = vector.broadcast %cst_22 : f32 to vector<8x128xf32>
    %72 = arith.select %69, %70, %71 : vector<8x128xi1>, vector<8x128xf32>
    %c0_i32_23 = arith.constant 0 : i32
    %73 = vector.broadcast %c0_i32_23 : i32 to vector<8x128xi32>
    %74 = arith.cmpi eq, %64, %73 : vector<8x128xi32>
    %c1_i32 = arith.constant 1 : i32
    %75 = vector.broadcast %c1_i32 : i32 to vector<8x128xi32>
    %76 = arith.cmpi eq, %63, %75 : vector<8x128xi32>
    %77 = arith.andi %74, %76 : vector<8x128xi1>
    %78 = vector.broadcast %56 : f32 to vector<8x128xf32>
    %79 = arith.select %77, %78, %72 : vector<8x128xi1>, vector<8x128xf32>
    %c0_i32_24 = arith.constant 0 : i32
    %80 = vector.broadcast %c0_i32_24 : i32 to vector<8x128xi32>
    %81 = arith.cmpi eq, %64, %80 : vector<8x128xi32>
    %c2_i32 = arith.constant 2 : i32
    %82 = vector.broadcast %c2_i32 : i32 to vector<8x128xi32>
    %83 = arith.cmpi eq, %63, %82 : vector<8x128xi32>
    %84 = arith.andi %81, %83 : vector<8x128xi1>
    %85 = vector.broadcast %62 : f32 to vector<8x128xf32>
    %86 = arith.select %84, %85, %79 : vector<8x128xi1>, vector<8x128xf32>
    %c0_25 = arith.constant 0 : index
    %c0_26 = arith.constant 0 : index
    %87 = vector.load %arg5[%c0_25, %c0_26] : memref<8x128xf32, #tpu.memory_space<vmem>>, vector<8x128xf32>
    tpu.vector_store %arg5[%c0_25, %c0_26], %86 {strides = array<i32>} : memref<8x128xf32, #tpu.memory_space<vmem>>, vector<8x128xf32>,
    return
  }
  func.func @transform_0(%arg0: i32) -> (i32, i32) {
    %c0_i32 = arith.constant 0 : i32
    %c0_i32_0 = arith.constant 0 : i32
    return %arg0, %c0_i32 : i32, i32
  }
  func.func @transform_1(%arg0: i32) -> (i32, i32) {
    %c0_i32 = arith.constant 0 : i32
    %c0_i32_0 = arith.constant 0 : i32
    return %arg0, %c0_i32 : i32, i32
  }
  func.func @transform_2(%arg0: i32) -> (i32, i32) {
    %c0_i32 = arith.constant 0 : i32
    %c0_i32_0 = arith.constant 0 : i32
    return %arg0, %c0_i32 : i32, i32
  }
  func.func @transform_3(%arg0: i32) -> (i32, i32) {
    %c0_i32 = arith.constant 0 : i32
    %c0_i32_0 = arith.constant 0 : i32
    %c0_i32_1 = arith.constant 0 : i32
    return %c0_i32, %c0_i32_0 : i32, i32
  }
  func.func @transform_4(%arg0: i32) -> (i32, i32) {
    %c0_i32 = arith.constant 0 : i32
    %c0_i32_0 = arith.constant 0 : i32
    return %arg0, %c0_i32 : i32, i32
  }
}

</mosaic_0001>

<bundles_post_ra>
// kernel: protopnet_loss.1
= control target key start
LH: loop header
LB: loop body
LE: loop exit
PB: predicated region body
PF: predicated region fallthrough
CT: control target
= control target key end

     0   :  { %vm35_vm0 = vcmask 31744   ;;  %v140_v1 = vmov 0   ;;  %v22_v6 = vlaneseq  ;;  %v141_v11 = vmov 0.0   ;;  %s193_s0 = inlined_call_operand.vmem [shape: f32[8,4], index: 0, kind: input, shape index: {}]   ;;  %s194_s1 = inlined_call_operand.vmem [shape: s32[8,1], index: 1, kind: input, shape index: {}]   ;;  %s195_s3 = inlined_call_operand.vmem [shape: s32[1,16], index: 3, kind: input, shape index: {}]   ;;  %s196_s2 = inlined_call_operand.vmem [shape: f32[8,16], index: 2, kind: input, shape index: {}]   ;;  %s197_s4 = inlined_call_operand.vmem [shape: f32[8,128], index: 4, kind: output, shape index: {}]  }
   0x1   :  { %v17_v0 = vld [vmem:[%s193_s0] sm:$0xff]  ;;  %135 = vset.pattern.permute.xlu0 %v140_v1  ;;  %vm62_vm3 = vcmask 130048   ;;  %vm73_vm4 = vcmask 7168  }
   0x2   :  { %v36_v2 = vsel %vm35_vm0, %v17_v0, -inf  ;;  %v18_v3 = vld [vmem:[%s194_s1] sm:$0xff]  ;;  %v175_v8 = vand.u32 127, %v22_v6  ;;  %v23_v58 = vshrl.u32 %v22_v6, 7 }
   0x3   :  { %37 = vmax.xlane.f32.xlu0 %v36_v2  ;;  %v125_v10 = vld [vmem:[%s195_s3] ss:$0 sm:$0xff] }
   0x4   :  { %v19_v13 = vld [vmem:[%s196_s2] sm:$0xff]  ;;  %vm106_vm5 = vcmp.eq.s32.totalorder %v23_v58, 0  ;;  %vm107_vm6 = vcmp.eq.s32.totalorder %v175_v8, 0  ;;  %vm111_vm8 = vcmp.eq.s32.totalorder %v175_v8, 1  ;;  %vm115_vm9 = vcmp.eq.s32.totalorder %v175_v8, 2 }
   0x5   :  { %v60_v15 = vsub.f32 100.0, %v19_v13  ;;  %vm108_vm7 = vmand %vm106_vm5, %vm107_vm6 }
   0x6   :  { %vm112_vm10 = vmand %vm106_vm5, %vm111_vm8 }
   0x7   :  { %vm116_vm11 = vmand %vm106_vm5, %vm115_vm9 }
  0x19   :  { %30 = vperm.xlu0 %135, %v18_v3  }
  0x90   :  { %v38_v4 = vpop.xlane.xlu0 %37 }
  0x91   :  { %v39_v5 = vsub.f32 %v17_v0, %v38_v4 }
  0x93   :  { %v40_v7 = vmul.f32 1.442695, %v39_v5 }
  0x95   :  { %136 = vpow2.f32 %v40_v7 }
  0x98   :  { %v31_v9 = vpop.permute.xlu0 %30 }
  0x99   :  { %vm32_vm1 = vcmp.eq.s32.totalorder %v175_v8, %v31_v9  ;;  %vm57_vm2 = vcmp.eq.s32.totalorder %v125_v10, %v31_v9 }
  0x9a   :  { %v124_v12 = vsel %vm32_vm1, 1.0, %v141_v11  ;;  %v126_v17 = vsel %vm57_vm2, 1.0, %v141_v11 }
  0x9b   :  { %v48_v14 = vmul.f32 %v124_v12, %v17_v0  ;;  %v61_v20 = vmul.f32 %v126_v17, %v60_v15 }
  0x9d   :  { %v49_v19 = vsel %vm35_vm0, %v48_v14, 0.0  ;;  %v63_v21 = vsel %vm62_vm3, %v61_v20, -inf  ;;  %v67_v22 = vsub.f32 %v60_v15, %v61_v20 }
  0x9f   :  { %v137_v16 = vpop.eup %136  ;;  %v68_v23 = vsel %vm62_vm3, %v67_v22, -inf }
  0xa0   :  { %v42_v18 = vsel %vm35_vm0, %v137_v16, 0.0 }
  0xa1   :  { %43 = vadd.xlane.f32.xlu1 %v42_v18 }
  0xa5   :  { %50 = vadd.xlane.f32.xlu1 %v49_v19 }
  0xa9   :  { %64 = vmax.xlane.f32.xlu1 %v63_v21 }
  0xad   :  { %69 = vmax.xlane.f32.xlu1 %v68_v23 }
 0x12e   :  { %v44_v24 = vpop.xlane.xlu1 %43 }
 0x12f   :  { %138 = vlog2.f32 %v44_v24 }
 0x132   :  { %v51_v25 = vpop.xlane.xlu1 %50 }
 0x136   :  { %v65_v26 = vpop.xlane.xlu1 %64 }
 0x137   :  { %v66_v27 = vsub.f32 100.0, %v65_v26 }
 0x139   :  { %v139_v28 = vpop.eup %138  ;;  %v85_v29 = vsel %vm73_vm4, %v66_v27, 0.0 }
 0x13a   :  { %v46_v30 = vmul.f32 0.6931472, %v139_v28  ;;  %86 = vadd.xlane.f32.xlu1 %v85_v29  ;;  %v70_v32 = vpop.xlane.xlu1 %69 }
 0x13b   :  { %v71_v34 = vsub.f32 100.0, %v70_v32 }
 0x13c   :  { %v47_v31 = vadd.f32 %v46_v30, %v38_v4 }
 0x13d   :  { %v96_v36 = vsel %vm73_vm4, %v71_v34, 0.0 }
 0x13e   :  { %v52_v33 = vsub.f32 %v47_v31, %v51_v25 }
 0x140   :  { %v74_v35 = vsel %vm73_vm4, %v52_v33, 0.0 }
 0x141   :  { %75 = vadd.xlane.f32.xlu1 %v74_v35 }
 0x145   :  { %97 = vadd.xlane.f32.xlu1 %v96_v36 }
 0x1c7   :  { %v87_v37 = vpop.xlane.xlu1 %86 }
 0x1c8   :  { %v88_v38 = vrot.slane %v87_v37, 4 }
 0x1ca   :  { %v89_v39 = vadd.f32 %v88_v38, %v87_v37 }
 0x1cc   :  { %v90_v40 = vrot.slane %v89_v39, 2 }
 0x1ce   :  { %v76_v41 = vpop.xlane.xlu1 %75  ;;  %v91_v45 = vadd.f32 %v90_v40, %v89_v39 }
 0x1cf   :  { %v77_v42 = vrot.slane %v76_v41, 4 }
 0x1d0   :  { %v92_v50 = vrot.slane %v91_v45, 1 }
 0x1d1   :  { %v78_v43 = vadd.f32 %v77_v42, %v76_v41 }
 0x1d2   :  { %v98_v44 = vpop.xlane.xlu1 %97  ;;  %v93_v55 = vadd.f32 %v92_v50, %v91_v45 }
 0x1d3   :  { %v79_v46 = vrot.slane %v78_v43, 2  ;;  %v99_v47 = vrot.slane %v98_v44, 4 }
 0x1d5   :  { %v100_v48 = vadd.f32 %v99_v47, %v98_v44  ;;  %v80_v49 = vadd.f32 %v79_v46, %v78_v43 }
 0x1d7   :  { %v101_v51 = vrot.slane %v100_v48, 2  ;;  %v81_v52 = vrot.slane %v80_v49, 1 }
 0x1d9   :  { %v102_v53 = vadd.f32 %v101_v51, %v100_v48  ;;  %v82_v54 = vadd.f32 %v81_v52, %v80_v49 }
 0x1db   :  { %127 = vpush %v82_v54  ;;  %v103_v56 = vrot.slane %v102_v53, 1 }
 0x1dc   :  { %129 = vpush %v93_v55 }
 0x1dd   :  { %v104_v57 = vadd.f32 %v103_v56, %v102_v53 }
 0x1df   :  { %131 = vpush %v104_v57 }
 0x20c   :  { %s128_s2 = spop %127 }
 0x20d   :  { %v109_v59 = vstv %s128_s2  ;;  %s130_s3 = spop %129 }
 0x20e   :  { %v110_v60 = vsel %vm108_vm7, %v109_v59, 0.0  ;;  %v113_v61 = vstv %s130_s3 }
 0x20f   :  { %v114_v62 = vsel %vm112_vm10, %v113_v61, %v110_v60 }
 0x210   :  { %s132_s21 = spop %131 }
 0x211   :  { %v117_v63 = vstv %s132_s21 }
 0x212   :  { %v118_v0 = vsel %vm116_vm11, %v117_v63, %v114_v62 }
 0x213   :  { %119 = vst [vmem:[%s197_s4] sm:$0xff] %v118_v0 }

</bundles_post_ra>
